<compile_context>
chip_gen: v7x
topology: tpu7x:2x2x1
jax: 0.10.0
libtpu: 0.0.40
codegen_flags: <defaults>
</compile_context>

<pallas_src>
import jax
import jax.numpy as jnp
from jax.experimental import pallas as pl
from jax.experimental.pallas import tpu as pltpu

_LANE = 128            # lane width: feature dims padded to multiples of this
_SUBLANE_BF16 = 16     # bf16 sublane packing: batch tiles are multiples of 16
_DEFAULT_TB = 512      # max batch tile (rows)
_VMEM_BUDGET = 32 << 20     # per-step working-set target (fits all generations)
_VMEM_LIMIT_CAP = 48 << 20  # explicit scoped-VMEM limit cap (< v7x 64 MiB physical)


def _cdiv(a: int, b: int) -> int:
    return -(-a // b)


def _pad_to(n: int, m: int) -> int:
    return ((n + m - 1) // m) * m


def _pad2d(x, rows, cols):
    r, c = x.shape
    return jnp.pad(x, ((0, rows - r), (0, cols - c)))


# ----------------------------------------------------------------------------- kernel
def _bimodal_kernel(tx_ref, ix_ref,
                    tw1_ref, tb1_ref, tw2_ref, tb2_ref,
                    iw1_ref, ib1_ref, iw2_ref, ib2_ref,
                    to_ref, io_ref):
    """Fused text + imp encoder (MLP -> ReLU -> MLP -> L2 row-normalize).

    tx_ref : (TB, Dt_p) bf16     ix_ref : (TB, Di_p) bf16
    *w*    : bf16 padded weights *b*    : (1, H_p)/(1, E_p) f32 biases
    to_ref / io_ref : (TB, E_p) bf16 outputs (lane-dense, padded cols are 0)
    """

    def encoder(x_ref, w1_ref, b1_ref, w2_ref, b2_ref, o_ref):
        x = x_ref[...]                       # already bf16 — no in-kernel cast
        b1 = b1_ref[...]                     # read biases once
        b2 = b2_ref[...]
        # Layer 1: bf16 MXU matmul, f32 accumulate; bias + ReLU in f32 on the VPU.
        h = jnp.dot(x, w1_ref[...], preferred_element_type=jnp.float32) + b1
        h = jnp.maximum(h, 0.0)
        # Layer 2: bf16 MXU matmul (h cast immediately -> half-size intermediate),
        # f32 accumulate; bias in f32.
        y = jnp.dot(h.astype(jnp.bfloat16), w2_ref[...],
                    preferred_element_type=jnp.float32) + b2
        # F.normalize(p=2, dim=1): y / max(||y||, 1e-12)  ==  y * rsqrt(max(sq, 1e-24)).
        # Padded output columns are exactly 0 (zero weight cols / zero bias pad), so
        # they do not perturb the norm.  rsqrt runs on the (otherwise idle) EUP.
        sq = jnp.sum(y * y, axis=1, keepdims=True)
        o_ref[...] = (y * jax.lax.rsqrt(jnp.maximum(sq, 1e-24))).astype(o_ref.dtype)

    encoder(tx_ref, tw1_ref, tb1_ref, tw2_ref, tb2_ref, to_ref)
    encoder(ix_ref, iw1_ref, ib1_ref, iw2_ref, ib2_ref, io_ref)


# ---------------------------------------------------------------------------- wrapper
def prepare_params(params):
    """Zero-pad all feature dims to 128 multiples; weights -> bf16, biases -> f32."""
    def prep(w, b):
        din, dout = w.shape
        din_p, dout_p = _pad_to(din, _LANE), _pad_to(dout, _LANE)
        w_p = _pad2d(w.astype(jnp.float32), din_p, dout_p).astype(jnp.bfloat16)
        b_p = _pad2d(b.astype(jnp.float32).reshape(1, -1), 1, dout_p)
        return w_p, b_p

    t_w1, t_b1 = prep(params["t_w1"], params["t_b1"])
    t_w2, t_b2 = prep(params["t_w2"], params["t_b2"])
    i_w1, i_b1 = prep(params["i_w1"], params["i_b1"])
    i_w2, i_b2 = prep(params["i_w2"], params["i_b2"])
    return dict(t_w1=t_w1, t_b1=t_b1, t_w2=t_w2, t_b2=t_b2,
                i_w1=i_w1, i_b1=i_b1, i_w2=i_w2, i_b2=i_b2)


def _vmem_needed(tb, dt_p, di_p, h_p, e_p, weight_bytes):
    """Per-step VMEM working set (bytes) for the chosen batch tile."""
    act_in = 2 * tb * (dt_p + di_p) * 2      # double-buffered bf16 input tiles
    act_out = 2 * 2 * tb * e_p * 2           # 2 outputs, double-buffered, bf16
    hidden = 2 * tb * h_p * 4                # f32 layer-1 intermediates (both encoders)
    return act_in + act_out + hidden + weight_bytes


def _choose_tiling(B, block_b, dt_p, di_p, h_p, e_p, weight_bytes):
    """Pick (tb, bp, vmem_limit): tb multiple of 16, low pad waste, >=2 grid steps when
    the batch allows it (v7x dual-TC), shrink if over the VMEM budget."""
    B16 = _pad_to(max(B, 1), _SUBLANE_BF16)
    if B16 <= _SUBLANE_BF16:
        tb = B16
        n = 1
    else:
        # At least 2 steps (keeps both v7x TensorCores busy); cap tile at block_b.
        n = max(2, _cdiv(B16, block_b))
        tb = _pad_to(_cdiv(B16, n), _SUBLANE_BF16)
        # Shrink tile (more steps) until the per-step working set fits the budget.
        while (_vmem_needed(tb, dt_p, di_p, h_p, e_p, weight_bytes) > _VMEM_BUDGET
               and tb > _SUBLANE_BF16):
            n += 1
            tb = _pad_to(_cdiv(B16, n), _SUBLANE_BF16)
    bp = n * tb
    needed = _vmem_needed(tb, dt_p, di_p, h_p, e_p, weight_bytes)
    vmem_limit = int(min(_VMEM_LIMIT_CAP, max(32 << 20, 2 * needed)))
    return tb, bp, vmem_limit


def bimodal_forward(text_input, imp_input, padded_params, embedding_dim,
                    *, block_b=_DEFAULT_TB):
    """Equivalent of BiModalModel.forward: returns (text_output, imp_output),
    each L2-normalized along dim=1 (emitted as bf16)."""
    p = padded_params
    B = text_input.shape[0]
    assert imp_input.shape[0] == B

    dt_p = p["t_w1"].shape[0]
    di_p = p["i_w1"].shape[0]
    h_p = p["t_w1"].shape[1]
    e_p = p["t_w2"].shape[1]

    weight_bytes = sum(int(p[k].size) * p[k].dtype.itemsize
                       for k in ("t_w1", "t_b1", "t_w2", "t_b2",
                                 "i_w1", "i_b1", "i_w2", "i_b2"))

    tb, bp, vmem_limit = _choose_tiling(B, block_b, dt_p, di_p, h_p, e_p, weight_bytes)

    # Inputs: cast to bf16 BEFORE padding (halves both the XLA pad copy and the
    # HBM->VMEM activation DMA), then zero-pad batch/feature dims.
    tx = _pad2d(text_input.astype(jnp.bfloat16), bp, dt_p)
    ix = _pad2d(imp_input.astype(jnp.bfloat16), bp, di_p)

    grid = (bp // tb,)

    def x_map(i):
        return (i, 0)

    def w_map(i):
        return (0, 0)

    def w_spec(shape):
        # Weights/biases are VMEM-resident (constant index map) — single-buffered.
        return pl.BlockSpec(shape, w_map, pipeline_mode=pl.Buffered(1))

    flops = 2 * bp * (dt_p * h_p + h_p * e_p) + 2 * bp * (di_p * h_p + h_p * e_p)
    bytes_accessed = (tx.size + ix.size) * 2 + weight_bytes + 2 * bp * e_p * 2

    text_out_p, imp_out_p = pl.pallas_call(
        _bimodal_kernel,
        out_shape=(jax.ShapeDtypeStruct((bp, e_p), jnp.bfloat16),
                   jax.ShapeDtypeStruct((bp, e_p), jnp.bfloat16)),
        grid=grid,
        in_specs=[
            pl.BlockSpec((tb, dt_p), x_map),          # text activations: tiled over batch
            pl.BlockSpec((tb, di_p), x_map),          # imp activations:  tiled over batch
            w_spec(p["t_w1"].shape),
            w_spec(p["t_b1"].shape),
            w_spec(p["t_w2"].shape),
            w_spec(p["t_b2"].shape),
            w_spec(p["i_w1"].shape),
            w_spec(p["i_b1"].shape),
            w_spec(p["i_w2"].shape),
            w_spec(p["i_b2"].shape),
        ],
        out_specs=[
            pl.BlockSpec((tb, e_p), x_map),
            pl.BlockSpec((tb, e_p), x_map),
        ],
        compiler_params=pltpu.CompilerParams(
            dimension_semantics=("parallel",),
            vmem_limit_bytes=vmem_limit),
        cost_estimate=pl.CostEstimate(
            flops=flops, transcendentals=2 * bp, bytes_accessed=bytes_accessed),
    )(tx, ix,
      p["t_w1"], p["t_b1"], p["t_w2"], p["t_b2"],
      p["i_w1"], p["i_b1"], p["i_w2"], p["i_b2"])

    return text_out_p[:B, :embedding_dim], imp_out_p[:B, :embedding_dim]


# --------------------------------------------------------------------------- reference
def _ref_forward(text_input, imp_input, params):
    def enc(x, w1, b1, w2, b2):
        h = jnp.maximum(x.astype(jnp.float32) @ w1 + b1, 0.0)
        y = h @ w2 + b2
        n = jnp.linalg.norm(y, axis=1, keepdims=True)
        return y / jnp.maximum(n, 1e-12)
    return (enc(text_input, params["t_w1"], params["t_b1"], params["t_w2"], params["t_b2"]),
            enc(imp_input, params["i_w1"], params["i_b1"], params["i_w2"], params["i_b2"]))


def _init_params(key, text_dim, imp_dim, hidden, embedding_dim):
    ks = jax.random.split(key, 8)

    def lin(kw, kb, fan_in, fan_out):
        bound = 1.0 / jnp.sqrt(fan_in)
        w = jax.random.uniform(kw, (fan_in, fan_out), jnp.float32, -bound, bound)
        b = jax.random.uniform(kb, (1, fan_out), jnp.float32, -bound, bound)
        return w, b

    t_w1, t_b1 = lin(ks[0], ks[1], text_dim, hidden)
    t_w2, t_b2 = lin(ks[2], ks[3], hidden, embedding_dim)
    i_w1, i_b1 = lin(ks[4], ks[5], imp_dim, hidden)
    i_w2, i_b2 = lin(ks[6], ks[7], hidden, embedding_dim)
    return dict(t_w1=t_w1, t_b1=t_b1, t_w2=t_w2, t_b2=t_b2,
                i_w1=i_w1, i_b1=i_b1, i_w2=i_w2, i_b2=i_b2)


if __name__ == "__main__":
    batch = 4
    text_dim = 32
    imp_dim = 16
    hidden = 64
    embedding_dim = 32

    key = jax.random.PRNGKey(0)
    k_text, k_imp, k_params = jax.random.split(key, 3)

    text_input = jax.random.normal(k_text, (batch, text_dim), jnp.float32)
    imp_input = jax.random.normal(k_imp, (batch, imp_dim), jnp.float32)
    params = _init_params(k_params, text_dim, imp_dim, hidden, embedding_dim)
    padded_params = prepare_params(params)

    text_out, imp_out = bimodal_forward(text_input, imp_input, padded_params, embedding_dim)
    jax.block_until_ready((text_out, imp_out))

    assert text_out.shape == (batch, embedding_dim)
    assert imp_out.shape == (batch, embedding_dim)

    # Rows are unit-norm (normalization computed in f32; outputs stored as bf16, so
    # allow bf16 rounding in the check).
    t32 = text_out.astype(jnp.float32)
    i32 = imp_out.astype(jnp.float32)
    tn = jnp.linalg.norm(t32, axis=1)
    inorm = jnp.linalg.norm(i32, axis=1)
    assert bool(jnp.allclose(tn, 1.0, atol=1e-2)), tn
    assert bool(jnp.allclose(inorm, 1.0, atol=1e-2)), inorm

    # Semantics match the pure-JAX f32 reference (tolerance loosened for bf16 MXU
    # matmuls and bf16 output storage).
    ref_t, ref_i = _ref_forward(text_input, imp_input, params)
    assert bool(jnp.allclose(t32, ref_t, atol=2e-2, rtol=2e-2))
    assert bool(jnp.allclose(i32, ref_i, atol=2e-2, rtol=2e-2))

    print("KERNEL_OK")
</pallas_src>

<mosaic_0001>
module attributes {stable_mosaic.version = 11 : i64} {
  func.func @_bimodal_kernel(%arg0: i32, %arg1: memref<16x128xbf16, #tpu.memory_space<vmem>>, %arg2: memref<16x128xbf16, #tpu.memory_space<vmem>>, %arg3: memref<128x128xbf16, #tpu.memory_space<vmem>>, %arg4: memref<1x128xf32, #tpu.memory_space<vmem>>, %arg5: memref<128x128xbf16, #tpu.memory_space<vmem>>, %arg6: memref<1x128xf32, #tpu.memory_space<vmem>>, %arg7: memref<128x128xbf16, #tpu.memory_space<vmem>>, %arg8: memref<1x128xf32, #tpu.memory_space<vmem>>, %arg9: memref<128x128xbf16, #tpu.memory_space<vmem>>, %arg10: memref<1x128xf32, #tpu.memory_space<vmem>>, %arg11: memref<16x128xbf16, #tpu.memory_space<vmem>>, %arg12: memref<16x128xbf16, #tpu.memory_space<vmem>>) attributes {dimension_semantics = [#tpu.dimension_semantics<parallel>], iteration_bounds = array<i64: 1>, scalar_prefetch = 0 : i64, scratch_operands = 0 : i64, tpu.core_type = #tpu.core_type<tc>, window_params = [{transform_indices = @transform_0, window_bounds = array<i64: 16, 128>}, {transform_indices = @transform_1, window_bounds = array<i64: 16, 128>}, {pipeline_mode = #tpu.pipeline_mode<synchronous>, transform_indices = @transform_2, window_bounds = array<i64: 128, 128>}, {pipeline_mode = #tpu.pipeline_mode<synchronous>, transform_indices = @transform_3, window_bounds = array<i64: 1, 128>}, {pipeline_mode = #tpu.pipeline_mode<synchronous>, transform_indices = @transform_4, window_bounds = array<i64: 128, 128>}, {pipeline_mode = #tpu.pipeline_mode<synchronous>, transform_indices = @transform_5, window_bounds = array<i64: 1, 128>}, {pipeline_mode = #tpu.pipeline_mode<synchronous>, transform_indices = @transform_6, window_bounds = array<i64: 128, 128>}, {pipeline_mode = #tpu.pipeline_mode<synchronous>, transform_indices = @transform_7, window_bounds = array<i64: 1, 128>}, {pipeline_mode = #tpu.pipeline_mode<synchronous>, transform_indices = @transform_8, window_bounds = array<i64: 128, 128>}, {pipeline_mode = #tpu.pipeline_mode<synchronous>, transform_indices = @transform_9, window_bounds = array<i64: 1, 128>}, {transform_indices = @transform_10, window_bounds = array<i64: 16, 128>}, {transform_indices = @transform_11, window_bounds = array<i64: 16, 128>}]} {
    %c0 = arith.constant 0 : index
    %c0_0 = arith.constant 0 : index
    %0 = vector.load %arg1[%c0, %c0_0] : memref<16x128xbf16, #tpu.memory_space<vmem>>, vector<16x128xbf16>
    %c0_1 = arith.constant 0 : index
    %c0_2 = arith.constant 0 : index
    %1 = vector.load %arg4[%c0_1, %c0_2] : memref<1x128xf32, #tpu.memory_space<vmem>>, vector<1x128xf32>
    %c0_3 = arith.constant 0 : index
    %c0_4 = arith.constant 0 : index
    %2 = vector.load %arg6[%c0_3, %c0_4] : memref<1x128xf32, #tpu.memory_space<vmem>>, vector<1x128xf32>
    %c0_5 = arith.constant 0 : index
    %c0_6 = arith.constant 0 : index
    %3 = vector.load %arg3[%c0_5, %c0_6] : memref<128x128xbf16, #tpu.memory_space<vmem>>, vector<128x128xbf16>
    %cst = arith.constant dense<0.000000e+00> : vector<16x128xf32>
    %4 = tpu.matmul %0, %3, %cst {dimension_numbers = #tpu.dot_dimension_numbers<[1], [0], [0], [1], [0, 0, 1, 1], [], []>} : vector<16x128xbf16>, vector<128x128xbf16>, vector<16x128xf32> -> vector<16x128xf32>
    %5 = vector.broadcast %1 : vector<1x128xf32> to vector<16x128xf32>
    %6 = arith.addf %4, %5 : vector<16x128xf32>
    %cst_7 = arith.constant 0.000000e+00 : f32
    %7 = vector.broadcast %cst_7 : f32 to vector<16x128xf32>
    %8 = arith.maximumf %6, %7 : vector<16x128xf32>
    %9 = arith.truncf %8 : vector<16x128xf32> to vector<16x128xbf16>
    %c0_8 = arith.constant 0 : index
    %c0_9 = arith.constant 0 : index
    %10 = vector.load %arg5[%c0_8, %c0_9] : memref<128x128xbf16, #tpu.memory_space<vmem>>, vector<128x128xbf16>
    %cst_10 = arith.constant dense<0.000000e+00> : vector<16x128xf32>
    %11 = tpu.matmul %9, %10, %cst_10 {dimension_numbers = #tpu.dot_dimension_numbers<[1], [0], [0], [1], [0, 0, 1, 1], [], []>} : vector<16x128xbf16>, vector<128x128xbf16>, vector<16x128xf32> -> vector<16x128xf32>
    %12 = vector.broadcast %2 : vector<1x128xf32> to vector<16x128xf32>
    %13 = arith.addf %11, %12 : vector<16x128xf32>
    %14 = arith.mulf %13, %13 : vector<16x128xf32>
    %cst_11 = arith.constant dense<0.000000e+00> : vector<16xf32>
    %15 = vector.multi_reduction <add>, %14, %cst_11 [1] : vector<16x128xf32> to vector<16xf32>
    %16 = vector.shape_cast %15 : vector<16xf32> to vector<16x1xf32>
    %cst_12 = arith.constant 1.000000e-24 : f32
    %17 = vector.broadcast %cst_12 : f32 to vector<16x1xf32>
    %18 = arith.maximumf %16, %17 : vector<16x1xf32>
    %19 = math.rsqrt %18 : vector<16x1xf32>
    %20 = vector.broadcast %19 : vector<16x1xf32> to vector<16x128xf32>
    %21 = arith.mulf %13, %20 : vector<16x128xf32>
    %22 = arith.truncf %21 : vector<16x128xf32> to vector<16x128xbf16>
    %c0_13 = arith.constant 0 : index
    %c0_14 = arith.constant 0 : index
    %23 = vector.load %arg11[%c0_13, %c0_14] : memref<16x128xbf16, #tpu.memory_space<vmem>>, vector<16x128xbf16>
    tpu.vector_store %arg11[%c0_13, %c0_14], %22 {strides = array<i32>} : memref<16x128xbf16, #tpu.memory_space<vmem>>, vector<16x128xbf16>,
    %c0_15 = arith.constant 0 : index
    %c0_16 = arith.constant 0 : index
    %24 = vector.load %arg2[%c0_15, %c0_16] : memref<16x128xbf16, #tpu.memory_space<vmem>>, vector<16x128xbf16>
    %c0_17 = arith.constant 0 : index
    %c0_18 = arith.constant 0 : index
    %25 = vector.load %arg8[%c0_17, %c0_18] : memref<1x128xf32, #tpu.memory_space<vmem>>, vector<1x128xf32>
    %c0_19 = arith.constant 0 : index
    %c0_20 = arith.constant 0 : index
    %26 = vector.load %arg10[%c0_19, %c0_20] : memref<1x128xf32, #tpu.memory_space<vmem>>, vector<1x128xf32>
    %c0_21 = arith.constant 0 : index
    %c0_22 = arith.constant 0 : index
    %27 = vector.load %arg7[%c0_21, %c0_22] : memref<128x128xbf16, #tpu.memory_space<vmem>>, vector<128x128xbf16>
    %cst_23 = arith.constant dense<0.000000e+00> : vector<16x128xf32>
    %28 = tpu.matmul %24, %27, %cst_23 {dimension_numbers = #tpu.dot_dimension_numbers<[1], [0], [0], [1], [0, 0, 1, 1], [], []>} : vector<16x128xbf16>, vector<128x128xbf16>, vector<16x128xf32> -> vector<16x128xf32>
    %29 = vector.broadcast %25 : vector<1x128xf32> to vector<16x128xf32>
    %30 = arith.addf %28, %29 : vector<16x128xf32>
    %cst_24 = arith.constant 0.000000e+00 : f32
    %31 = vector.broadcast %cst_24 : f32 to vector<16x128xf32>
    %32 = arith.maximumf %30, %31 : vector<16x128xf32>
    %33 = arith.truncf %32 : vector<16x128xf32> to vector<16x128xbf16>
    %c0_25 = arith.constant 0 : index
    %c0_26 = arith.constant 0 : index
    %34 = vector.load %arg9[%c0_25, %c0_26] : memref<128x128xbf16, #tpu.memory_space<vmem>>, vector<128x128xbf16>
    %cst_27 = arith.constant dense<0.000000e+00> : vector<16x128xf32>
    %35 = tpu.matmul %33, %34, %cst_27 {dimension_numbers = #tpu.dot_dimension_numbers<[1], [0], [0], [1], [0, 0, 1, 1], [], []>} : vector<16x128xbf16>, vector<128x128xbf16>, vector<16x128xf32> -> vector<16x128xf32>
    %36 = vector.broadcast %26 : vector<1x128xf32> to vector<16x128xf32>
    %37 = arith.addf %35, %36 : vector<16x128xf32>
    %38 = arith.mulf %37, %37 : vector<16x128xf32>
    %cst_28 = arith.constant dense<0.000000e+00> : vector<16xf32>
    %39 = vector.multi_reduction <add>, %38, %cst_28 [1] : vector<16x128xf32> to vector<16xf32>
    %40 = vector.shape_cast %39 : vector<16xf32> to vector<16x1xf32>
    %cst_29 = arith.constant 1.000000e-24 : f32
    %41 = vector.broadcast %cst_29 : f32 to vector<16x1xf32>
    %42 = arith.maximumf %40, %41 : vector<16x1xf32>
    %43 = math.rsqrt %42 : vector<16x1xf32>
    %44 = vector.broadcast %43 : vector<16x1xf32> to vector<16x128xf32>
    %45 = arith.mulf %37, %44 : vector<16x128xf32>
    %46 = arith.truncf %45 : vector<16x128xf32> to vector<16x128xbf16>
    %c0_30 = arith.constant 0 : index
    %c0_31 = arith.constant 0 : index
    %47 = vector.load %arg12[%c0_30, %c0_31] : memref<16x128xbf16, #tpu.memory_space<vmem>>, vector<16x128xbf16>
    tpu.vector_store %arg12[%c0_30, %c0_31], %46 {strides = array<i32>} : memref<16x128xbf16, #tpu.memory_space<vmem>>, vector<16x128xbf16>,
    return
  }
  func.func @transform_0(%arg0: i32) -> (i32, i32) {
    %c0_i32 = arith.constant 0 : i32
    %c0_i32_0 = arith.constant 0 : i32
    return %arg0, %c0_i32 : i32, i32
  }
  func.func @transform_1(%arg0: i32) -> (i32, i32) {
    %c0_i32 = arith.constant 0 : i32
    %c0_i32_0 = arith.constant 0 : i32
    return %arg0, %c0_i32 : i32, i32
  }
  func.func @transform_2(%arg0: i32) -> (i32, i32) {
    %c0_i32 = arith.constant 0 : i32
    %c0_i32_0 = arith.constant 0 : i32
    %c0_i32_1 = arith.constant 0 : i32
    return %c0_i32, %c0_i32_0 : i32, i32
  }
  func.func @transform_3(%arg0: i32) -> (i32, i32) {
    %c0_i32 = arith.constant 0 : i32
    %c0_i32_0 = arith.constant 0 : i32
    %c0_i32_1 = arith.constant 0 : i32
    return %c0_i32, %c0_i32_0 : i32, i32
  }
  func.func @transform_4(%arg0: i32) -> (i32, i32) {
    %c0_i32 = arith.constant 0 : i32
    %c0_i32_0 = arith.constant 0 : i32
    %c0_i32_1 = arith.constant 0 : i32
    return %c0_i32, %c0_i32_0 : i32, i32
  }
  func.func @transform_5(%arg0: i32) -> (i32, i32) {
    %c0_i32 = arith.constant 0 : i32
    %c0_i32_0 = arith.constant 0 : i32
    %c0_i32_1 = arith.constant 0 : i32
    return %c0_i32, %c0_i32_0 : i32, i32
  }
  func.func @transform_6(%arg0: i32) -> (i32, i32) {
    %c0_i32 = arith.constant 0 : i32
    %c0_i32_0 = arith.constant 0 : i32
    %c0_i32_1 = arith.constant 0 : i32
    return %c0_i32, %c0_i32_0 : i32, i32
  }
  func.func @transform_7(%arg0: i32) -> (i32, i32) {
    %c0_i32 = arith.constant 0 : i32
    %c0_i32_0 = arith.constant 0 : i32
    %c0_i32_1 = arith.constant 0 : i32
    return %c0_i32, %c0_i32_0 : i32, i32
  }
  func.func @transform_8(%arg0: i32) -> (i32, i32) {
    %c0_i32 = arith.constant 0 : i32
    %c0_i32_0 = arith.constant 0 : i32
    %c0_i32_1 = arith.constant 0 : i32
    return %c0_i32, %c0_i32_0 : i32, i32
  }
  func.func @transform_9(%arg0: i32) -> (i32, i32) {
    %c0_i32 = arith.constant 0 : i32
    %c0_i32_0 = arith.constant 0 : i32
    %c0_i32_1 = arith.constant 0 : i32
    return %c0_i32, %c0_i32_0 : i32, i32
  }
  func.func @transform_10(%arg0: i32) -> (i32, i32) {
    %c0_i32 = arith.constant 0 : i32
    %c0_i32_0 = arith.constant 0 : i32
    return %arg0, %c0_i32 : i32, i32
  }
  func.func @transform_11(%arg0: i32) -> (i32, i32) {
    %c0_i32 = arith.constant 0 : i32
    %c0_i32_0 = arith.constant 0 : i32
    return %arg0, %c0_i32 : i32, i32
  }
}

</mosaic_0001>

<bundles_post_ra>
// kernel: tpu_custom_call.1
= control target key start
LH: loop header
LB: loop body
LE: loop exit
PB: predicated region body
PF: predicated region fallthrough
CT: control target
= control target key end

     0   :  { %17 = vsyncpa [#allocation3], 0  ;;  %s1351_s0 = inlined_call_operand.hbm [shape: bf16[16,128], index: 0, kind: input, shape index: {}]   ;;  %s1352_s1 = inlined_call_operand.hbm [shape: bf16[16,128], index: 1, kind: input, shape index: {}]   ;;  %s1353_s2 = inlined_call_operand.hbm [shape: bf16[128,128], index: 2, kind: input, shape index: {}]   ;;  %s1354_s3 = inlined_call_operand.vmem [shape: f32[1,128], index: 3, kind: input, shape index: {}]   ;;  %s1355_s4 = inlined_call_operand.hbm [shape: bf16[128,128], index: 4, kind: input, shape index: {}]   ;;  %s1356_s5 = inlined_call_operand.vmem [shape: f32[1,128], index: 5, kind: input, shape index: {}]   ;;  %s1357_s6 = inlined_call_operand.hbm [shape: bf16[128,128], index: 6, kind: input, shape index: {}]   ;;  %s1358_s7 = inlined_call_operand.vmem [shape: f32[1,128], index: 7, kind: input, shape index: {}]   ;;  %s1359_s8 = inlined_call_operand.hbm [shape: bf16[128,128], index: 8, kind: input, shape index: {}]   ;;  %s1360_s9 = inlined_call_operand.vmem [shape: f32[1,128], index: 9, kind: input, shape index: {}]   ;;  %s1361_s10 = inlined_call_operand.hbm [shape: bf16[16,128], index: 10, kind: output, shape index: {0}]   ;;  %s1362_s11 = inlined_call_operand.hbm [shape: bf16[16,128], index: 11, kind: output, shape index: {1}]  }
   0x1   :  { %18 = vsyncpa [#allocation6], 0 }
   0x2   :  { %19 = vsyncpa [#allocation9], 0 }
   0x3   :  { %20 = vsyncpa [#allocation12], 0 }
   0x4   :  { %21 = vsyncpa [#allocation4], 0 }
   0x5   :  { %22 = vsyncpa [#allocation15], 0  ;;  %s1086_s17 = smov [#allocation5]   ;;  %s1087_s19 = smov [#allocation8]  }
   0x6   :  { %s40_s18 = sshll.u32 %s1086_s17, 4  ;;  %s66_s20 = sshll.u32 %s1087_s19, 4  ;;  %s41_s18 = int_to_ptr.vmem [resolvable:$true] %s40_s18  ;;  %s1158_s20 = int_to_ptr.vmem [resolvable:$true] %s66_s20 }
   0x7   :  { %s898_s23 = scalar_lea.hbm %s1352_s1, 128 }
   0x8   :  { %p899_p0 = scmp.ne.s32.totalorder %s1352_s1, %s898_s23  ;;  %p902_p1 = scmp.lt.u32.totalorder %s898_s23, %s1352_s1 }
   0xa   :  { %p904_p2 = pnand %p902_p1, %p899_p0 }
   0xc   :  { %907 = shalt.err (!%p904_p2)
}
   0xd   :  { %s908_s28 = scalar_lea.vmem %s41_s18, 128  ;;  %p913_p4 = scmp.lt.s32.totalorder %s41_s18, %s41_s18 }
   0xe   :  { %p909_p3 = scmp.ne.s32.totalorder %s41_s18, %s908_s28  ;;  %p914_p5 = scmp.lt.s32.totalorder %s908_s28, %s908_s28 }
  0x10   :  { %p915_p6 = por %p914_p5, %p913_p4 }
  0x12   :  { %p916_p7 = pnand %p915_p6, %p909_p3 }
  0x14   :  { %919 = shalt.err (!%p916_p7)
}
  0x15   :  { %s1088_s29 = smov 64   ;;  %s1089_s30 = smov 4  }
  0x16   :  { %46 = dma.hbm_to_vmem [thread:$0]  %s1352_s1, 128, %s41_s18, [#allocation6], %s1088_s29, %s1088_s29, %s1089_s30  }
  0x17   :  { %s920_s16 = scalar_lea.hbm %s1355_s4, 1024 }
  0x18   :  { %p921_p8 = scmp.ne.s32.totalorder %s1355_s4, %s920_s16  ;;  %p924_p9 = scmp.lt.u32.totalorder %s920_s16, %s1355_s4 }
  0x1a   :  { %p926_p10 = pnand %p924_p9, %p921_p8 }
  0x1c   :  { %929 = shalt.err (!%p926_p10)
}
  0x1d   :  { %s930_s23 = scalar_lea.vmem %s1158_s20, 1024  ;;  %p935_p12 = scmp.lt.s32.totalorder %s1158_s20, %s1158_s20 }
  0x1e   :  { %p931_p11 = scmp.ne.s32.totalorder %s1158_s20, %s930_s23  ;;  %p936_p13 = scmp.lt.s32.totalorder %s930_s23, %s930_s23 }
  0x20   :  { %p937_p0 = por %p936_p13, %p935_p12 }
  0x22   :  { %p938_p1 = pnand %p937_p0, %p931_p11 }
  0x24   :  { %941 = shalt.err (!%p938_p1)
}
  0x25   :  { %72 = dma.hbm_to_vmem [thread:$0]  %s1355_s4, 1024, %s1158_s20, [#allocation9], %s1088_s29, %s1088_s29, %s1089_s30  }
  0x26   :  { %s1090_s24 = smov [#allocation2]   ;;  %s1091_s26 = smov [#allocation7]  }
  0x27   :  { %s28_s25 = sshll.u32 %s1090_s24, 4  ;;  %s52_s27 = sshll.u32 %s1091_s26, 4  ;;  %s29_s25 = int_to_ptr.vmem [resolvable:$true] %s28_s25  ;;  %s1195_s27 = int_to_ptr.vmem [resolvable:$true] %s52_s27 }
  0x28   :  { %s942_s13 = scalar_lea.hbm %s1351_s0, 128 }
  0x29   :  { %p943_p2 = scmp.ne.s32.totalorder %s1351_s0, %s942_s13  ;;  %p946_p3 = scmp.lt.u32.totalorder %s942_s13, %s1351_s0 }
  0x2b   :  { %p948_p4 = pnand %p946_p3, %p943_p2 }
  0x2d   :  { %951 = shalt.err (!%p948_p4)
}
  0x2e   :  { %s952_s4 = scalar_lea.vmem %s29_s25, 128  ;;  %p957_p6 = scmp.lt.s32.totalorder %s29_s25, %s29_s25 }
  0x2f   :  { %p953_p5 = scmp.ne.s32.totalorder %s29_s25, %s952_s4  ;;  %p958_p7 = scmp.lt.s32.totalorder %s952_s4, %s952_s4 }
  0x31   :  { %p959_p8 = por %p958_p7, %p957_p6 }
  0x33   :  { %p960_p9 = pnand %p959_p8, %p953_p5 }
  0x35   :  { %963 = shalt.err (!%p960_p9)
}
  0x36   :  { %34 = dma.hbm_to_vmem [thread:$0]  %s1351_s0, 128, %s29_s25, [#allocation3], %s1088_s29, %s1088_s29, %s1089_s30  }
  0x37   :  { %s964_s23 = scalar_lea.hbm %s1353_s2, 1024 }
  0x38   :  { %p965_p10 = scmp.ne.s32.totalorder %s1353_s2, %s964_s23  ;;  %p968_p11 = scmp.lt.u32.totalorder %s964_s23, %s1353_s2 }
  0x3a   :  { %p970_p12 = pnand %p968_p11, %p965_p10 }
  0x3c   :  { %973 = shalt.err (!%p970_p12)
}
  0x3d   :  { %s974_s28 = scalar_lea.vmem %s1195_s27, 1024  ;;  %p979_p0 = scmp.lt.s32.totalorder %s1195_s27, %s1195_s27 }
  0x3e   :  { %p975_p13 = scmp.ne.s32.totalorder %s1195_s27, %s974_s28  ;;  %p980_p1 = scmp.lt.s32.totalorder %s974_s28, %s974_s28 }
  0x40   :  { %p981_p2 = por %p980_p1, %p979_p0 }
  0x42   :  { %p982_p3 = pnand %p981_p2, %p975_p13 }
  0x44   :  { %985 = shalt.err (!%p982_p3)
}
  0x45   :  { %58 = dma.hbm_to_vmem [thread:$0]  %s1353_s2, 1024, %s1195_s27, [#allocation6], %s1088_s29, %s1088_s29, %s1089_s30  }
  0x46   :  { %s1092_s12 = smov [#allocation10]   ;;  %s1093_s14 = smov [#allocation11]  }
  0x47   :  { %s80_s13 = sshll.u32 %s1092_s12, 4  ;;  %s94_s15 = sshll.u32 %s1093_s14, 4  ;;  %s81_s13 = int_to_ptr.vmem [resolvable:$true] %s80_s13  ;;  %s1232_s15 = int_to_ptr.vmem [resolvable:$true] %s94_s15 }
  0x48   :  { %s986_s4 = scalar_lea.hbm %s1357_s6, 1024 }
  0x49   :  { %p987_p4 = scmp.ne.s32.totalorder %s1357_s6, %s986_s4  ;;  %p990_p5 = scmp.lt.u32.totalorder %s986_s4, %s1357_s6 }
  0x4b   :  { %p992_p6 = pnand %p990_p5, %p987_p4 }
  0x4d   :  { %995 = shalt.err (!%p992_p6)
}
  0x4e   :  { %s996_s2 = scalar_lea.vmem %s81_s13, 1024  ;;  %p1001_p8 = scmp.lt.s32.totalorder %s81_s13, %s81_s13 }
  0x4f   :  { %p997_p7 = scmp.ne.s32.totalorder %s81_s13, %s996_s2  ;;  %p1002_p9 = scmp.lt.s32.totalorder %s996_s2, %s996_s2 }
  0x51   :  { %p1003_p10 = por %p1002_p9, %p1001_p8 }
  0x53   :  { %p1004_p11 = pnand %p1003_p10, %p997_p7 }
  0x55   :  { %1007 = shalt.err (!%p1004_p11)
}
  0x56   :  { %86 = dma.hbm_to_vmem [thread:$0]  %s1357_s6, 1024, %s81_s13, [#allocation9], %s1088_s29, %s1088_s29, %s1089_s30  }
  0x57   :  { %s1008_s24 = scalar_lea.hbm %s1359_s8, 1024 }
  0x58   :  { %p1009_p12 = scmp.ne.s32.totalorder %s1359_s8, %s1008_s24  ;;  %p1012_p13 = scmp.lt.u32.totalorder %s1008_s24, %s1359_s8 }
  0x5a   :  { %p1014_p0 = pnand %p1012_p13, %p1009_p12 }
  0x5c   :  { %1017 = shalt.err (!%p1014_p0)
}
  0x5d   :  { %s1018_s12 = scalar_lea.vmem %s1232_s15, 1024  ;;  %p1023_p2 = scmp.lt.s32.totalorder %s1232_s15, %s1232_s15 }
  0x5e   :  { %p1019_p1 = scmp.ne.s32.totalorder %s1232_s15, %s1018_s12  ;;  %p1024_p3 = scmp.lt.s32.totalorder %s1018_s12, %s1018_s12 }
  0x60   :  { %p1025_p4 = por %p1024_p3, %p1023_p2 }
  0x62   :  { %p1026_p5 = pnand %p1025_p4, %p1019_p1 }
  0x64   :  { %1029 = shalt.err (!%p1026_p5)
}
  0x65   :  { %100 = dma.hbm_to_vmem [thread:$0]  %s1359_s8, 1024, %s1232_s15, [#allocation12], %s1088_s29, %s1088_s29, %s1089_s30  }
  0x66   :  { %1074 = dma.done.wait [#allocation3], 128  }
  0x67   :  { %1075 = vsyncadd [#allocation3], 4294967168 }
  0x68   :  { %1076 = dma.done.wait [#allocation6], 1152  }
  0x69   :  { %1077 = vsyncadd [#allocation6], 4294966144 }
  0x6a   :  { %1078 = dma.done.wait [#allocation9], 2048  }
  0x6b   :  { %1079 = vsyncadd [#allocation9], 4294965248 }
  0x6c   :  { %1080 = dma.done.wait [#allocation12], 1024  }
  0x6d   :  { %1081 = vsyncadd [#allocation12], 4294966272  ;;  %v1094_v0 = vmov 0.0   ;;  %vm1095_vm0 = vmmov 0   ;;  %v856_v1 = vld [vmem:[#allocation7] sm:$0xff]   ;;  %v857_v2 = vld [vmem:[#allocation7 + $0x8] sm:$0xff]  }
  0x6e   :  { %764 = vmatprep.subr.bf16.mxu0 %v1094_v0  ;;  %780 = vmatprep.mubr.msk.bf16.mxu0 %vm1095_vm0, %v1094_v0  ;;  %v858_v3 = vld [vmem:[#allocation7 + $0x10] sm:$0xff]   ;;  %v859_v4 = vld [vmem:[#allocation7 + $0x18] sm:$0xff]   ;;  %v860_v5 = vld [vmem:[#allocation7 + $0x20] sm:$0xff]  }
  0x6f   :  { %784 = vmatprep.subr.bf16.mxu1 %v1094_v0  ;;  %800 = vmatprep.mubr.msk.bf16.mxu1 %vm1095_vm0, %v1094_v0  ;;  %v861_v6 = vld [vmem:[#allocation7 + $0x28] sm:$0xff]   ;;  %v874_v7 = vld [vmem:[#allocation8] sm:$0xff]   ;;  %v862_v9 = vld [vmem:[#allocation7 + $0x30] sm:$0xff]  }
  0x70   :  { %765 = vmatpush3.bf16.msra.mxu0 %v856_v1  ;;  %785 = vmatpush3.bf16.msra.mxu1 %v874_v7  ;;  %v875_v8 = vld [vmem:[#allocation8 + $0x8] sm:$0xff]   ;;  %v863_v10 = vld [vmem:[#allocation7 + $0x38] sm:$0xff]   ;;  %v876_v11 = vld [vmem:[#allocation8 + $0x10] sm:$0xff]  }
  0x71   :  { %766 = vmatprep.subr.bf16.mxu0 %v1094_v0  ;;  %786 = vmatprep.subr.bf16.mxu1 %v1094_v0  ;;  %v877_v12 = vld [vmem:[#allocation8 + $0x18] sm:$0xff]   ;;  %v864_v13 = vld [vmem:[#allocation2] sm:$0xff]   ;;  %v865_v14 = vld [vmem:[#allocation10] sm:$0xff]  }
  0x72   :  { %v878_v15 = vld [vmem:[#allocation8 + $0x20] sm:$0xff]   ;;  %v866_v16 = vld [vmem:[#allocation10 + $0x8] sm:$0xff]   ;;  %v867_v18 = vld [vmem:[#allocation10 + $0x10] sm:$0xff]  }
  0x73   :  { %v879_v17 = vld [vmem:[#allocation8 + $0x28] sm:$0xff]   ;;  %v868_v19 = vld [vmem:[#allocation10 + $0x18] sm:$0xff]   ;;  %v869_v20 = vld [vmem:[#allocation10 + $0x20] sm:$0xff]  }
  0x74   :  { %767 = vmatpush3.bf16.msra.mxu0 %v857_v2  ;;  %787 = vmatpush3.bf16.msra.mxu1 %v875_v8  ;;  %v870_v21 = vld [vmem:[#allocation10 + $0x28] sm:$0xff]   ;;  %v871_v22 = vld [vmem:[#allocation10 + $0x30] sm:$0xff]   ;;  %v872_v23 = vld [vmem:[#allocation10 + $0x38] sm:$0xff]  }
  0x75   :  { %768 = vmatprep.subr.bf16.mxu0 %v1094_v0  ;;  %788 = vmatprep.subr.bf16.mxu1 %v1094_v0  ;;  %v873_v24 = vld [vmem:[#allocation5] sm:$0xff]   ;;  %v880_v25 = vld [vmem:[#allocation8 + $0x30] sm:$0xff]   ;;  %v882_v36 = vld [vmem:[#allocation11] sm:$0xff]  }
  0x76   :  { %v881_v26 = vld [vmem:[#allocation8 + $0x38] sm:$0xff]   ;;  %v672_v27 = vld [vmem:[%s1354_s3] ss:$0 sm:$0xff]  ;;  %v883_v38 = vld [vmem:[#allocation11 + $0x8] sm:$0xff]  }
  0x77   :  { %v884_v39 = vld [vmem:[#allocation11 + $0x10] sm:$0xff]   ;;  %v885_v40 = vld [vmem:[#allocation11 + $0x18] sm:$0xff]   ;;  %v886_v41 = vld [vmem:[#allocation11 + $0x20] sm:$0xff]  }
  0x78   :  { %769 = vmatpush3.bf16.msra.mxu0 %v858_v3  ;;  %789 = vmatpush3.bf16.msra.mxu1 %v876_v11  ;;  %v887_v42 = vld [vmem:[#allocation11 + $0x28] sm:$0xff]   ;;  %v693_v43 = vld [vmem:[%s1358_s7] ss:$0 sm:$0xff]  ;;  %v889_v49 = vld [vmem:[#allocation11 + $0x38] sm:$0xff]  }
  0x79   :  { %770 = vmatprep.subr.bf16.mxu0 %v1094_v0  ;;  %790 = vmatprep.subr.bf16.mxu1 %v1094_v0  ;;  %v888_v44 = vld [vmem:[#allocation11 + $0x30] sm:$0xff]  }
  0x7a   :  { %v682_v55 = vld [vmem:[%s1356_s5] ss:$0 sm:$0xff]  ;;  %s1096_s5 = smov [#allocation13]  }
  0x7c   :  { %771 = vmatpush3.bf16.msra.mxu0 %v859_v4  ;;  %791 = vmatpush3.bf16.msra.mxu1 %v877_v12 }
  0x7d   :  { %772 = vmatprep.subr.bf16.mxu0 %v1094_v0  ;;  %792 = vmatprep.subr.bf16.mxu1 %v1094_v0 }
  0x80   :  { %773 = vmatpush3.bf16.msra.mxu0 %v860_v5  ;;  %793 = vmatpush3.bf16.msra.mxu1 %v878_v15 }
  0x81   :  { %774 = vmatprep.subr.bf16.mxu0 %v1094_v0  ;;  %794 = vmatprep.subr.bf16.mxu1 %v1094_v0 }
  0x84   :  { %775 = vmatpush3.bf16.msra.mxu0 %v861_v6  ;;  %795 = vmatpush3.bf16.msra.mxu1 %v879_v17 }
  0x85   :  { %776 = vmatprep.subr.bf16.mxu0 %v1094_v0  ;;  %796 = vmatprep.subr.bf16.mxu1 %v1094_v0 }
  0x88   :  { %777 = vmatpush3.bf16.msra.mxu0 %v862_v9  ;;  %797 = vmatpush3.bf16.msra.mxu1 %v880_v25 }
  0x89   :  { %778 = vmatprep.subr.bf16.mxu0 %v1094_v0  ;;  %798 = vmatprep.subr.bf16.mxu1 %v1094_v0 }
  0x8c   :  { %779 = vmatpush3.bf16.msra.mxu0 %v863_v10  ;;  %799 = vmatpush3.bf16.msra.mxu1 %v881_v26 }
  0x8d   :  { %804 = vmatprep.subr.bf16.mxu0 %v1094_v0  ;;  %824 = vmatprep.subr.bf16.mxu1 %v1094_v0 }
  0x8f   :  { %781 = vmatmul.mubr.bf16.vlgmr.msra.gmra.mrb[0].mxu0 %v864_v13 }
  0x90   :  { %805 = vmatpush3.bf16.msra.mxu0 %v865_v14  ;;  %820 = vmatprep.mubr.msk.bf16.mxu0 %vm1095_vm0, %v1094_v0 }
  0x91   :  { %806 = vmatprep.subr.bf16.mxu0 %v1094_v0 }
  0x94   :  { %807 = vmatpush3.bf16.msra.mxu0 %v866_v16 }
  0x95   :  { %808 = vmatprep.subr.bf16.mxu0 %v1094_v0 }
  0x98   :  { %809 = vmatpush3.bf16.msra.mxu0 %v867_v18 }
  0x99   :  { %810 = vmatprep.subr.bf16.mxu0 %v1094_v0 }
  0x9c   :  { %811 = vmatpush3.bf16.msra.mxu0 %v868_v19 }
  0x9d   :  { %812 = vmatprep.subr.bf16.mxu0 %v1094_v0 }
  0xa0   :  { %813 = vmatpush3.bf16.msra.mxu0 %v869_v20 }
  0xa1   :  { %814 = vmatprep.subr.bf16.mxu0 %v1094_v0 }
  0xa4   :  { %815 = vmatpush3.bf16.msra.mxu0 %v870_v21 }
  0xa5   :  { %816 = vmatprep.subr.bf16.mxu0 %v1094_v0 }
  0xa8   :  { %817 = vmatpush3.bf16.msra.mxu0 %v871_v22 }
  0xa9   :  { %818 = vmatprep.subr.bf16.mxu0 %v1094_v0 }
  0xac   :  { %819 = vmatpush3.bf16.msra.mxu0 %v872_v23 }
  0xaf   :  { %821 = vmatmul.mubr.bf16.vlgmr.msra.gmra.mrb[4].mxu0 %v873_v24 }
 0x162   :  { %v236_v28 = vpop.f32.mrb[0].mxu0 }
 0x163   :  { %v237_v29 = vadd.f32 %v672_v27, %v236_v28  ;;  %v782_v30 = vpop.f32.mrb[1].mxu0 }
 0x164   :  { %v239_v31 = vpop.f32.mrb[2].mxu0 }
 0x165   :  { %v243_v32 = vmax.f32 %v237_v29, 0.0  ;;  %v240_v33 = vadd.f32 %v672_v27, %v239_v31  ;;  %v783_v34 = vpop.f32.mrb[3].mxu0 }
 0x167   :  { %v244_v35 = vmax.f32 %v240_v33, 0.0 }
 0x169   :  { %v245_v37 = vpack.c.bf16 %v244_v35, %v243_v32 }
 0x16b   :  { %801 = vmatmul.mubr.bf16.vlgmr.msra.gmra.mrb[0].mxu1 %v245_v37 }
 0x16c   :  { %825 = vmatpush3.bf16.msra.mxu1 %v882_v36  ;;  %840 = vmatprep.mubr.msk.bf16.mxu1 %vm1095_vm0, %v1094_v0 }
 0x16d   :  { %826 = vmatprep.subr.bf16.mxu1 %v1094_v0 }
 0x170   :  { %827 = vmatpush3.bf16.msra.mxu1 %v883_v38 }
 0x171   :  { %828 = vmatprep.subr.bf16.mxu1 %v1094_v0 }
 0x174   :  { %829 = vmatpush3.bf16.msra.mxu1 %v884_v39 }
 0x175   :  { %830 = vmatprep.subr.bf16.mxu1 %v1094_v0 }
 0x178   :  { %831 = vmatpush3.bf16.msra.mxu1 %v885_v40 }
 0x179   :  { %832 = vmatprep.subr.bf16.mxu1 %v1094_v0 }
 0x17c   :  { %833 = vmatpush3.bf16.msra.mxu1 %v886_v41 }
 0x17d   :  { %834 = vmatprep.subr.bf16.mxu1 %v1094_v0 }
 0x180   :  { %835 = vmatpush3.bf16.msra.mxu1 %v887_v42 }
 0x181   :  { %836 = vmatprep.subr.bf16.mxu1 %v1094_v0 }
 0x182   :  { %v493_v45 = vpop.f32.mrb[4].mxu0 }
 0x183   :  { %v494_v46 = vadd.f32 %v693_v43, %v493_v45  ;;  %v822_v47 = vpop.f32.mrb[5].mxu0 }
 0x184   :  { %v496_v48 = vpop.f32.mrb[6].mxu0  ;;  %837 = vmatpush3.bf16.msra.mxu1 %v888_v44 }
 0x185   :  { %v497_v50 = vadd.f32 %v693_v43, %v496_v48  ;;  %v823_v51 = vpop.f32.mrb[7].mxu0  ;;  %838 = vmatprep.subr.bf16.mxu1 %v1094_v0  ;;  %v500_v52 = vmax.f32 %v494_v46, 0.0  ;;  %v703_v0 = vld [vmem:[%s1360_s9] ss:$0 sm:$0xff]  ;;  %s641_s9 = sshll.u32 %s1096_s5, 4  ;;  %s642_s9 = int_to_ptr.vmem [resolvable:$true] %s641_s9 }
 0x186   :  { %s1030_s20 = scalar_lea.vmem %s642_s9, 128  ;;  %p1035_p7 = scmp.lt.s32.totalorder %s642_s9, %s642_s9 }
 0x187   :  { %v501_v53 = vmax.f32 %v497_v50, 0.0  ;;  %p1031_p6 = scmp.ne.s32.totalorder %s642_s9, %s1030_s20  ;;  %p1036_p8 = scmp.lt.s32.totalorder %s1030_s20, %s1030_s20 }
 0x188   :  { %839 = vmatpush3.bf16.msra.mxu1 %v889_v49 }
 0x189   :  { %v502_v54 = vpack.c.bf16 %v501_v53, %v500_v52  ;;  %p1037_p9 = por %p1036_p8, %p1035_p7 }
 0x18b   :  { %841 = vmatmul.mubr.bf16.vlgmr.msra.gmra.mrb[4].mxu1 %v502_v54  ;;  %p1038_p10 = pnand %p1037_p9, %p1031_p6 }
 0x23e   :  { %v350_v56 = vpop.f32.mrb[0].mxu1 }
 0x23f   :  { %v351_v57 = vadd.f32 %v682_v55, %v350_v56  ;;  %v802_v58 = vpop.f32.mrb[1].mxu1 }
 0x240   :  { %v353_v59 = vpop.f32.mrb[2].mxu1 }
 0x241   :  { %v354_v60 = vadd.f32 %v682_v55, %v353_v59  ;;  %v803_v61 = vpop.f32.mrb[3].mxu1  ;;  %v357_v62 = vmul.f32 %v351_v57, %v351_v57 }
 0x243   :  { %359 = vadd.xlane.f32.xlu0 %v357_v62  ;;  %v358_v63 = vmul.f32 %v354_v60, %v354_v60 }
 0x247   :  { %361 = vadd.xlane.f32.xlu0 %v358_v63 }
 0x25e   :  { %v607_v1 = vpop.f32.mrb[4].mxu1 }
 0x25f   :  { %v608_v2 = vadd.f32 %v703_v0, %v607_v1  ;;  %v842_v3 = vpop.f32.mrb[5].mxu1 }
 0x260   :  { %v610_v4 = vpop.f32.mrb[6].mxu1 }
 0x261   :  { %v611_v5 = vadd.f32 %v703_v0, %v610_v4  ;;  %v843_v6 = vpop.f32.mrb[7].mxu1  ;;  %v614_v7 = vmul.f32 %v608_v2, %v608_v2 }
 0x263   :  { %616 = vadd.xlane.f32.xlu1 %v614_v7  ;;  %v615_v8 = vmul.f32 %v611_v5, %v611_v5 }
 0x267   :  { %618 = vadd.xlane.f32.xlu1 %v615_v8 }
 0x2d0   :  { %v360_v9 = vpop.xlane.xlu0 %359 }
 0x2d1   :  { %v363_v10 = vmax.f32 %v360_v9, 1e-24 }
 0x2d3   :  { %890 = vrsqrt.f32 %v363_v10 }
 0x2d4   :  { %v362_v11 = vpop.xlane.xlu0 %361 }
 0x2d5   :  { %v364_v12 = vmax.f32 %v362_v11, 1e-24 }
 0x2d7   :  { %892 = vrsqrt.f32 %v364_v12 }
 0x2dd   :  { %v891_v13 = vpop.eup %890 }
 0x2de   :  { %v367_v15 = vmul.f32 %v891_v13, %v351_v57 }
 0x2e1   :  { %v893_v14 = vpop.eup %892 }
 0x2e2   :  { %v368_v16 = vmul.f32 %v893_v14, %v354_v60 }
 0x2e4   :  { %v721_v17 = vpack.c.bf16 %v368_v16, %v367_v15 }
 0x2e6   :  { %722 = vst [vmem:[#allocation13] sm:$0xff] %v721_v17  }
 0x2e7   :  { %1041 = shalt.err (!%p1038_p10)
}
 0x2e8   :  { %s1042_s22 = scalar_lea.hbm %s1361_s10, 128 }
 0x2e9   :  { %p1043_p11 = scmp.ne.s32.totalorder %s1361_s10, %s1042_s22  ;;  %p1046_p12 = scmp.lt.u32.totalorder %s1042_s22, %s1361_s10 }
 0x2eb   :  { %p1048_p13 = pnand %p1046_p12, %p1043_p11 }
 0x2ed   :  { %1051 = shalt.err (!%p1048_p13)
}
 0x2ee   :  { %647 = dma.vmem_to_hbm [thread:$0]  %s642_s9, 128, %s1361_s10, [#allocation4], %s1088_s29, %s1088_s29, %s1089_s30  }
 0x2ef   :  { %s1097_s26 = smov [#allocation14]  }
 0x2f0   :  { %v617_v18 = vpop.xlane.xlu1 %616  ;;  %s653_s28 = sshll.u32 %s1097_s26, 4  ;;  %s654_s28 = int_to_ptr.vmem [resolvable:$true] %s653_s28 }
 0x2f1   :  { %v620_v19 = vmax.f32 %v617_v18, 1e-24  ;;  %s1052_s0 = scalar_lea.vmem %s654_s28, 128  ;;  %p1057_p1 = scmp.lt.s32.totalorder %s654_s28, %s654_s28 }
 0x2f2   :  { %p1053_p0 = scmp.ne.s32.totalorder %s654_s28, %s1052_s0  ;;  %p1058_p2 = scmp.lt.s32.totalorder %s1052_s0, %s1052_s0 }
 0x2f3   :  { %894 = vrsqrt.f32 %v620_v19 }
 0x2f4   :  { %v619_v20 = vpop.xlane.xlu1 %618  ;;  %p1059_p3 = por %p1058_p2, %p1057_p1 }
 0x2f5   :  { %v621_v21 = vmax.f32 %v619_v20, 1e-24 }
 0x2f6   :  { %p1060_p4 = pnand %p1059_p3, %p1053_p0 }
 0x2f7   :  { %896 = vrsqrt.f32 %v621_v21 }
 0x2fd   :  { %v895_v22 = vpop.eup %894 }
 0x2fe   :  { %v624_v24 = vmul.f32 %v895_v22, %v608_v2 }
 0x301   :  { %v897_v23 = vpop.eup %896 }
 0x302   :  { %v625_v25 = vmul.f32 %v897_v23, %v611_v5 }
 0x304   :  { %v726_v26 = vpack.c.bf16 %v625_v25, %v624_v24 }
 0x306   :  { %727 = vst [vmem:[#allocation14] sm:$0xff] %v726_v26  }
 0x307   :  { %1063 = shalt.err (!%p1060_p4)
}
 0x308   :  { %s1064_s12 = scalar_lea.hbm %s1362_s11, 128 }
 0x309   :  { %p1065_p5 = scmp.ne.s32.totalorder %s1362_s11, %s1064_s12  ;;  %p1068_p6 = scmp.lt.u32.totalorder %s1064_s12, %s1362_s11 }
 0x30b   :  { %p1070_p7 = pnand %p1068_p6, %p1065_p5 }
 0x30d   :  { %1073 = shalt.err (!%p1070_p7)
}
 0x30e   :  { %659 = dma.vmem_to_hbm [thread:$0]  %s654_s28, 128, %s1362_s11, [#allocation15], %s1088_s29, %s1088_s29, %s1089_s30  }
 0x30f   :  { %1082 = dma.done.wait [#allocation4], 128  }
 0x310   :  { %1083 = vsyncadd [#allocation4], 4294967168 }
 0x311   :  { %1084 = dma.done.wait [#allocation15], 128  }
 0x312   :  { %1085 = vsyncadd [#allocation15], 4294967168 }
 0x313   :  { %666 = vsyncpa [#allocation3], 1 }
 0x314   :  { %667 = vsyncpa [#allocation6], 1 }
 0x315   :  { %668 = vsyncpa [#allocation9], 1 }
 0x316   :  { %669 = vsyncpa [#allocation12], 1 }
 0x317   :  { %670 = vsyncpa [#allocation4], 1 }
 0x318   :  { %671 = vsyncpa [#allocation15], 1 }

</bundles_post_ra>
